<compile_context>
chip_gen: v7x
topology: tpu7x:2x2x1
jax: 0.10.0
libtpu: 0.0.40
codegen_flags: <defaults>
</compile_context>

<pallas_src>
import functools
import numpy as np
import jax
import jax.numpy as jnp
from jax.experimental import pallas as pl
from jax.experimental.pallas import tpu as pltpu

SPECIAL_TOKEN_IDS = [i for i in range(999) if i != 100]


# --------------------------------------------------------------------------
# helpers
# --------------------------------------------------------------------------
def _round_up(x, m):
    return ((x + m - 1) // m) * m


def _p_normalize(sv, p):
    """F.normalize(p=p, dim=1), eps=1e-12; fast sqrt path for p == 2."""
    p = float(p)
    if p == 2.0:
        nrm = jnp.sqrt(jnp.sum(sv * sv, axis=1, keepdims=True))
    else:
        nrm = jnp.power(jnp.sum(jnp.power(jnp.abs(sv), p), axis=1, keepdims=True),
                        1.0 / p)
    return sv / jnp.maximum(nrm, 1e-12)


def _vmem_cap_bytes():
    """Per-generation scoped-VMEM cap: ~3/4 of physical VMEM (≈96 MB on
    v5e/v6e's 128 MiB, ≈48 MB on v7x's 64 MiB); conservative fallback."""
    try:
        phys = int(pltpu.get_tpu_info().vmem_capacity_bytes)
    except Exception:
        phys = 64 << 20
    return max((phys * 3) // 4, 32 << 20)


def _sparse_vmem_bytes(bb, S, H, tv):
    """VMEM budget incl. double-buffered streamed tiles, the live f32 logits
    intermediate and reshape temporaries (per perf review)."""
    return (2 * H * tv * 2            # weight tile (bf16), double-buffered
            + 2 * bb * S * H * 2      # hidden block (bf16), double-buffered
            + 2 * bb * S * 4          # attention-mask block (f32)
            + 2 * bb * tv * 4         # output block (f32)
            + 2 * 2 * tv * 4          # bias + special-mask tiles
            + bb * S * tv * 4         # f32 logits intermediate
            + bb * S * H * 2          # reshape temporary of the hidden block
            + (4 << 20))              # scheduler / spill headroom


def _select_bb(B, S, H, tv, vmem_cap):
    """Largest divisor of B whose budget fits VMEM: prefers nb=1 so the hidden
    block index is constant over the V axis and its HBM fetch is single-pass,
    and M = bb*S fed to the MXU is as large as possible."""
    bb = B
    while bb > 1 and _sparse_vmem_bytes(bb, S, H, tv) > vmem_cap:
        bb -= 1
        while bb > 1 and B % bb != 0:
            bb -= 1
    return max(bb, 1)


def prepare_sparse_params(emb_weight_vh, bias_v, special_ids, tv=4096):
    """One-time (checkpoint-load time) prep of the tied sparse_proj params:
    transpose to input-major (H, V), cast to bf16, pad V up to a multiple of
    the vocab tile tv.  No per-call pad / copy of the big weight."""
    V, H = emb_weight_vh.shape
    tv = max(128, (min(int(tv), _round_up(V, 128)) // 128) * 128)
    Vp = _round_up(V, tv)
    w_hv = jnp.asarray(emb_weight_vh).T.astype(jnp.bfloat16)        # (H, V)
    bias = jnp.asarray(bias_v, dtype=jnp.float32).reshape(1, V)
    sp = np.ones((V,), np.float32)
    sp[np.asarray(special_ids)] = 0.0
    sp = jnp.asarray(sp).reshape(1, V)
    if Vp != V:
        w_hv = jnp.pad(w_hv, ((0, 0), (0, Vp - V)))
        bias = jnp.pad(bias, ((0, 0), (0, Vp - V)))
        sp = jnp.pad(sp, ((0, 0), (0, Vp - V)))
    return {"w_hv": w_hv, "bias": bias, "sp": sp,
            "V": V, "Vp": Vp, "tv": tv, "H": H}


# --------------------------------------------------------------------------
# Kernel 1: sparse vector head (sparse_proj -> mask -> max over seq -> post)
#   grid = (V tiles, batch blocks); normalization done outside the kernel.
# --------------------------------------------------------------------------
def _sparse_kernel(apply_relu, log_sat,
                   hid_ref, mask_ref, w_ref, b_ref, sp_ref, out_ref):
    bb, S, H = hid_ref.shape
    tv = w_ref.shape[1]
    # Fold batch rows into M so the MXU sees M = bb*S instead of S.
    h = hid_ref[...].reshape(bb * S, H)                               # bf16
    logits = jnp.dot(h, w_ref[...], preferred_element_type=jnp.float32)
    logits = logits.reshape(bb, S, tv)
    if apply_relu:
        # mask_ref is an additive mask (0 on valid tokens / -1e30 on masked).
        # The bias is constant over S so it commutes with the max; adding it
        # after the max plus the relu reproduces the original
        # mask-as-multiply semantics with a single elementwise pass over the
        # big (bb, S, tv) intermediate.
        mx = jnp.max(logits + mask_ref[...], axis=1)                  # (bb, tv)
        mx = jnp.maximum(mx + b_ref[...], 0.0) * sp_ref[...]
    else:
        # Exact original semantics: masked positions contribute 0 to the max.
        mx = jnp.max((logits + b_ref[...]) * mask_ref[...], axis=1)
        mx = mx * sp_ref[...]
    if log_sat:
        mx = jnp.log1p(mx)
    out_ref[...] = mx.reshape(bb, 1, tv)


def sparse_vector_pallas(hidden, attn_mask, params, apply_relu=True,
                         log_sat=False, norm_power=2.0):
    """hidden: (B,S,H); params: output of prepare_sparse_params (load-time)."""
    B, S, H = hidden.shape
    assert H == params["H"]
    V, Vp, tv = params["V"], params["Vp"], params["tv"]
    nv = Vp // tv

    vmem_cap = _vmem_cap_bytes()
    bb = _select_bb(B, S, H, tv, vmem_cap)
    nb = B // bb

    h_bf = hidden.astype(jnp.bfloat16)
    mask_f = attn_mask.astype(jnp.float32).reshape(B, S, 1)
    if apply_relu:
        mask_f = (mask_f - 1.0) * 1e30     # 0 on valid tokens, -1e30 on masked

    kernel = functools.partial(_sparse_kernel, apply_relu, log_sat)
    out = pl.pallas_call(
        kernel,
        out_shape=jax.ShapeDtypeStruct((B, 1, Vp), jnp.float32),
        grid_spec=pltpu.PrefetchScalarGridSpec(
            num_scalar_prefetch=0,
            # V tiles outer / batch inner: each weight tile is streamed from
            # HBM once and reused across batch blocks; with nb == 1 the hidden
            # block index is constant so its DMA is single-pass as well.
            grid=(nv, nb),
            in_specs=[
                pl.BlockSpec((bb, S, H), lambda v, b: (b, 0, 0)),   # hidden
                pl.BlockSpec((bb, S, 1), lambda v, b: (b, 0, 0)),   # attn mask
                pl.BlockSpec((H, tv), lambda v, b: (0, v)),         # weight tile
                pl.BlockSpec((1, tv), lambda v, b: (0, v)),         # bias tile
                pl.BlockSpec((1, tv), lambda v, b: (0, v)),         # special mask
            ],
            out_specs=pl.BlockSpec((bb, 1, tv), lambda v, b: (b, 0, v)),
        ),
        compiler_params=pltpu.CompilerParams(
            # V is the megacore-split axis (each TC streams only its half of
            # the weight); the batch axis runs sequentially inside.
            dimension_semantics=("parallel", "arbitrary"),
            vmem_limit_bytes=int(vmem_cap)),
    )(h_bf, mask_f, params["w_hv"], params["bias"], params["sp"])

    sv = out.reshape(B, Vp)[:, :V]
    return _p_normalize(sv, norm_power)        # tiny XLA epilogue


# --------------------------------------------------------------------------
# Kernel 2: psg_transform (dense + gelu + LayerNorm) + reranker Linear(H, 1)
#   passage rows tiled ("parallel"); bf16 MXU operands; lane-dense output.
# --------------------------------------------------------------------------
def _rerank_kernel(x_ref, wt_ref, bt_ref, g_ref, beta_ref, wr_ref, br_ref,
                   out_ref):
    x = x_ref[...]                                                    # (TP, H) bf16
    t = jnp.dot(x, wt_ref[...], preferred_element_type=jnp.float32) + bt_ref[...]
    t = jax.nn.gelu(t, approximate=False)                             # BERT gelu (erf)
    mu = jnp.mean(t, axis=-1, keepdims=True)
    var = jnp.mean(jnp.square(t - mu), axis=-1, keepdims=True)
    t = (t - mu) * jax.lax.rsqrt(var + 1e-12)                         # LayerNorm eps=1e-12
    t = t * g_ref[...] + beta_ref[...]
    # Linear(H, 1) as a lane reduction (XLU); one small XLU transpose makes
    # the stored block lane-dense (1, TP) instead of a 1-lane-wide column.
    scores = jnp.sum(t * wr_ref[...], axis=-1, keepdims=True)         # (TP, 1)
    out_ref[...] = scores.T + br_ref[...]                             # (1, TP)


def rerank_pallas(psg_vecs, wt, bt, gamma, beta, wr, br, tp=128):
    P, H = psg_vecs.shape
    TP = max(8, min(int(tp), _round_up(P, 8)))
    TP = (TP // 8) * 8
    Pp = _round_up(P, TP)
    x = jnp.zeros((Pp, H), jnp.bfloat16).at[:P].set(psg_vecs.astype(jnp.bfloat16))
    out = pl.pallas_call(
        _rerank_kernel,
        out_shape=jax.ShapeDtypeStruct((Pp // TP, TP), jnp.float32),
        grid_spec=pltpu.PrefetchScalarGridSpec(
            num_scalar_prefetch=0,
            grid=(Pp // TP,),
            in_specs=[
                pl.BlockSpec((TP, H), lambda i: (i, 0)),   # pooled passage vecs (bf16)
                pl.BlockSpec((H, H), lambda i: (0, 0)),    # dense weight (in-major, bf16)
                pl.BlockSpec((1, H), lambda i: (0, 0)),    # dense bias
                pl.BlockSpec((1, H), lambda i: (0, 0)),    # LN gamma
                pl.BlockSpec((1, H), lambda i: (0, 0)),    # LN beta
                pl.BlockSpec((1, H), lambda i: (0, 0)),    # reranker weight row
                pl.BlockSpec((1, 1), lambda i: (0, 0)),    # reranker bias
            ],
            out_specs=pl.BlockSpec((1, TP), lambda i: (i, 0)),
        ),
        compiler_params=pltpu.CompilerParams(
            dimension_semantics=("parallel",)),
    )(x, wt.astype(jnp.bfloat16), bt.reshape(1, H), gamma.reshape(1, H),
      beta.reshape(1, H), wr.reshape(1, H), br.reshape(1, 1))
    return out.reshape(Pp)[:P]


def score_psgs(hidden_np, sep_indices_np, wt, bt, gamma, beta, wr, br):
    """Replicates Dqr.score_psgs: pooling/gather on host, matmuls in Pallas."""
    Q, NSEP = sep_indices_np.shape
    P = NSEP - 1
    psgs_mask = np.zeros((Q, P), dtype=bool)
    psg_vectors = []
    for q in range(Q):
        for p in range(P):
            sep_idx = int(sep_indices_np[q, p])
            next_sep = int(sep_indices_np[q, p + 1])
            if next_sep <= sep_idx + 1:
                break
            psgs_mask[q, p] = True
            psg_vectors.append(hidden_np[q, sep_idx + 1:next_sep].mean(axis=0))
    psgs_logit = np.full((Q, P), np.nan, dtype=np.float32)
    if psg_vectors:
        psg_mat = jnp.asarray(np.stack(psg_vectors, axis=0), dtype=jnp.float32)
        logits = np.asarray(rerank_pallas(psg_mat, wt, bt, gamma, beta, wr, br))
        psgs_logit[psgs_mask] = logits
    return jnp.asarray(psgs_logit)


# --------------------------------------------------------------------------
# Pure-JAX reference for the sparse head (sanity check; same bf16 matmul path)
# --------------------------------------------------------------------------
def sparse_ref(hidden, attn_mask, w_vh, b, special_ids,
               apply_relu=True, log_sat=False, p=2.0):
    logits = jnp.einsum('bsh,vh->bsv',
                        hidden.astype(jnp.bfloat16), w_vh.astype(jnp.bfloat16),
                        preferred_element_type=jnp.float32) + b
    logits = logits * attn_mask[..., None].astype(jnp.float32)
    sv = jnp.max(logits, axis=1)
    sv = sv.at[:, jnp.asarray(special_ids)].set(0.0)
    if apply_relu:
        sv = jnp.maximum(sv, 0.0)
    if log_sat:
        sv = jnp.log1p(sv)
    return _p_normalize(sv, p)


if __name__ == "__main__":
    B, S, H, V = 2, 16, 128, 1536   # vocab >= 999 so special-token zeroing is meaningful
    key = jax.random.PRNGKey(0)
    ks = jax.random.split(key, 8)

    # encoder output stand-in + batch tensors
    hidden = jax.random.normal(ks[0], (B, S, H), jnp.float32)
    attn_mask = jnp.array([[1] * S, [1] * 12 + [0] * (S - 12)], dtype=jnp.int32)
    sep_indices = np.array([[0, 4, 8, 12], [0, 5, 9, 9]], dtype=np.int32)

    # deterministic parameters (PyTorch nn.Linear stores weight as (out, in))
    emb_weight = 0.02 * jax.random.normal(ks[1], (V, H), jnp.float32)  # tied sparse_proj.weight
    sp_bias = 0.02 * jax.random.normal(ks[2], (V,), jnp.float32)
    dense_w = 0.02 * jax.random.normal(ks[3], (H, H), jnp.float32)     # psg_transform.dense
    dense_b = 0.02 * jax.random.normal(ks[4], (H,), jnp.float32)
    ln_gamma = jnp.ones((H,), jnp.float32)
    ln_beta = jnp.zeros((H,), jnp.float32)
    rr_w = 0.02 * jax.random.normal(ks[5], (1, H), jnp.float32)        # reranker
    rr_b = 0.02 * jax.random.normal(ks[6], (1,), jnp.float32)

    # One-time, load-time param prep (transpose + bf16 cast + V padding):
    # no per-call HBM pass over the big projection weight.
    sparse_params = prepare_sparse_params(emb_weight, sp_bias,
                                          SPECIAL_TOKEN_IDS, tv=512)
    dense_w_t = jnp.asarray(dense_w.T)                                 # (H, H) input-major

    # forward: sparse_vector (Pallas) + psgs_logit (host pooling + Pallas matmuls)
    sparse_vec = sparse_vector_pallas(hidden, attn_mask, sparse_params,
                                      apply_relu=True, log_sat=False,
                                      norm_power=2.0)
    psgs_logit = score_psgs(np.asarray(hidden), sep_indices,
                            dense_w_t, dense_b, ln_gamma, ln_beta, rr_w, rr_b)

    jax.block_until_ready(sparse_vec)
    jax.block_until_ready(psgs_logit)

    ref = sparse_ref(hidden, attn_mask, emb_weight, sp_bias, SPECIAL_TOKEN_IDS)
    assert np.allclose(np.asarray(sparse_vec), np.asarray(ref),
                       rtol=2e-3, atol=2e-4)
    assert sparse_vec.shape == (B, V)
    assert psgs_logit.shape == (B, sep_indices.shape[1] - 1)

    print("KERNEL_OK")
</pallas_src>

<mosaic_0001>
module attributes {stable_mosaic.version = 11 : i64} {
  func.func @_sparse_kernel(%arg0: i32, %arg1: i32, %arg2: memref<2x16x128xbf16, #tpu.memory_space<vmem>>, %arg3: memref<2x16x1xf32, #tpu.memory_space<vmem>>, %arg4: memref<128x512xbf16, #tpu.memory_space<vmem>>, %arg5: memref<1x512xf32, #tpu.memory_space<vmem>>, %arg6: memref<1x512xf32, #tpu.memory_space<vmem>>, %arg7: memref<2x1x512xf32, #tpu.memory_space<vmem>>) attributes {dimension_semantics = [#tpu.dimension_semantics<parallel>, #tpu.dimension_semantics<arbitrary>], iteration_bounds = array<i64: 3, 1>, scalar_prefetch = 0 : i64, scratch_operands = 0 : i64, tpu.core_type = #tpu.core_type<tc>, window_params = [{transform_indices = @transform_0, window_bounds = array<i64: 2, 16, 128>}, {transform_indices = @transform_1, window_bounds = array<i64: 2, 16, 1>}, {transform_indices = @transform_2, window_bounds = array<i64: 128, 512>}, {transform_indices = @transform_3, window_bounds = array<i64: 1, 512>}, {transform_indices = @transform_4, window_bounds = array<i64: 1, 512>}, {transform_indices = @transform_5, window_bounds = array<i64: 2, 1, 512>}]} {
    %c0 = arith.constant 0 : index
    %c0_0 = arith.constant 0 : index
    %c0_1 = arith.constant 0 : index
    %0 = vector.load %arg2[%c0, %c0_0, %c0_1] : memref<2x16x128xbf16, #tpu.memory_space<vmem>>, vector<2x16x128xbf16>
    %1 = vector.shape_cast %0 : vector<2x16x128xbf16> to vector<32x128xbf16>
    %c0_2 = arith.constant 0 : index
    %c0_3 = arith.constant 0 : index
    %2 = vector.load %arg4[%c0_2, %c0_3] : memref<128x512xbf16, #tpu.memory_space<vmem>>, vector<128x512xbf16>
    %cst = arith.constant dense<0.000000e+00> : vector<32x512xf32>
    %3 = tpu.matmul %1, %2, %cst {dimension_numbers = #tpu.dot_dimension_numbers<[1], [0], [0], [1], [0, 0, 1, 1], [], []>} : vector<32x128xbf16>, vector<128x512xbf16>, vector<32x512xf32> -> vector<32x512xf32>
    %4 = vector.shape_cast %3 : vector<32x512xf32> to vector<2x16x512xf32>
    %c0_4 = arith.constant 0 : index
    %c0_5 = arith.constant 0 : index
    %c0_6 = arith.constant 0 : index
    %5 = vector.load %arg3[%c0_4, %c0_5, %c0_6] : memref<2x16x1xf32, #tpu.memory_space<vmem>>, vector<2x16x1xf32>
    %6 = vector.broadcast %5 : vector<2x16x1xf32> to vector<2x16x512xf32>
    %7 = arith.addf %4, %6 : vector<2x16x512xf32>
    %cst_7 = arith.constant dense<0xFF800000> : vector<2x512xf32>
    %8 = vector.multi_reduction <maximumf>, %7, %cst_7 [1] : vector<2x16x512xf32> to vector<2x512xf32>
    %c0_8 = arith.constant 0 : index
    %c0_9 = arith.constant 0 : index
    %9 = vector.load %arg5[%c0_8, %c0_9] : memref<1x512xf32, #tpu.memory_space<vmem>>, vector<1x512xf32>
    %10 = vector.broadcast %9 : vector<1x512xf32> to vector<2x512xf32>
    %11 = arith.addf %8, %10 : vector<2x512xf32>
    %cst_10 = arith.constant 0.000000e+00 : f32
    %12 = vector.broadcast %cst_10 : f32 to vector<2x512xf32>
    %13 = arith.maximumf %11, %12 : vector<2x512xf32>
    %c0_11 = arith.constant 0 : index
    %c0_12 = arith.constant 0 : index
    %14 = vector.load %arg6[%c0_11, %c0_12] : memref<1x512xf32, #tpu.memory_space<vmem>>, vector<1x512xf32>
    %15 = vector.broadcast %14 : vector<1x512xf32> to vector<2x512xf32>
    %16 = arith.mulf %13, %15 : vector<2x512xf32>
    %17 = vector.shape_cast %16 : vector<2x512xf32> to vector<2x1x512xf32>
    %c0_13 = arith.constant 0 : index
    %c0_14 = arith.constant 0 : index
    %c0_15 = arith.constant 0 : index
    %18 = vector.load %arg7[%c0_13, %c0_14, %c0_15] : memref<2x1x512xf32, #tpu.memory_space<vmem>>, vector<2x1x512xf32>
    tpu.vector_store %arg7[%c0_13, %c0_14, %c0_15], %17 {strides = array<i32>} : memref<2x1x512xf32, #tpu.memory_space<vmem>>, vector<2x1x512xf32>,
    return
  }
  func.func @transform_0(%arg0: i32, %arg1: i32) -> (i32, i32, i32) {
    %c0_i32 = arith.constant 0 : i32
    %c0_i32_0 = arith.constant 0 : i32
    %c0_i32_1 = arith.constant 0 : i32
    return %arg1, %c0_i32, %c0_i32_0 : i32, i32, i32
  }
  func.func @transform_1(%arg0: i32, %arg1: i32) -> (i32, i32, i32) {
    %c0_i32 = arith.constant 0 : i32
    %c0_i32_0 = arith.constant 0 : i32
    %c0_i32_1 = arith.constant 0 : i32
    return %arg1, %c0_i32, %c0_i32_0 : i32, i32, i32
  }
  func.func @transform_2(%arg0: i32, %arg1: i32) -> (i32, i32) {
    %c0_i32 = arith.constant 0 : i32
    %c0_i32_0 = arith.constant 0 : i32
    return %c0_i32, %arg0 : i32, i32
  }
  func.func @transform_3(%arg0: i32, %arg1: i32) -> (i32, i32) {
    %c0_i32 = arith.constant 0 : i32
    %c0_i32_0 = arith.constant 0 : i32
    return %c0_i32, %arg0 : i32, i32
  }
  func.func @transform_4(%arg0: i32, %arg1: i32) -> (i32, i32) {
    %c0_i32 = arith.constant 0 : i32
    %c0_i32_0 = arith.constant 0 : i32
    return %c0_i32, %arg0 : i32, i32
  }
  func.func @transform_5(%arg0: i32, %arg1: i32) -> (i32, i32, i32) {
    %c0_i32 = arith.constant 0 : i32
    %c0_i32_0 = arith.constant 0 : i32
    return %arg1, %c0_i32, %arg0 : i32, i32, i32
  }
}

</mosaic_0001>

<bundles_post_ra>
// kernel: tpu_custom_call.1
= control target key start
LH: loop header
LB: loop body
LE: loop exit
PB: predicated region body
PF: predicated region fallthrough
CT: control target
= control target key end

     0   :  { %10 = vsyncpa [#allocation3], 0  ;;  %s1658_s0 = inlined_call_operand.vmem [shape: bf16[2,16,128], index: 0, kind: input, shape index: {}]   ;;  %s1659_s1 = inlined_call_operand.vmem [shape: f32[2,16,1], index: 1, kind: input, shape index: {}]   ;;  %s1660_s2 = inlined_call_operand.hbm [shape: bf16[128,1536], index: 2, kind: input, shape index: {}]   ;;  %s1661_s3 = inlined_call_operand.vmem [shape: f32[1,1536], index: 3, kind: input, shape index: {}]   ;;  %s1662_s4 = inlined_call_operand.vmem [shape: f32[1,1536], index: 4, kind: input, shape index: {}]   ;;  %s1663_s5 = inlined_call_operand.hbm [shape: f32[2,1,1536], index: 5, kind: output, shape index: {}]  }
   0x1   :  { %12 = vsyncpa [#allocation3 + $0x1], 0 }
   0x2   :  { %13 = vsyncpa [#allocation4], 0 }
   0x3   :  { %15 = vsyncpa [#allocation4 + $0x1], 0  ;;  %s1371_s18 = smov 0   ;;  %s1373_s19 = smov 0  }
   0x4   :  { %s1375_s20 = smov 0   ;;  %s1377_s21 = smov 0  }
   0x5   :  { %s1379_s22 = smov 0   ;;  %s1381_s23 = smov 0  }
   0x6 LB: > { %s1040_s24 = sadd.s32 4294967295, %s1329_s23   ;;  %s1041_s25 = sadd.s32 4294967294, %s1329_s23   ;;  %s1329_s23 = sphi %s1381_s23, %s21_s23   ;;  %s1325_s22 = sphi %s1379_s22, %s1678_s22   ;;  %s1321_s21 = sphi %s1377_s21, %s1677_s21   ;;  %s1317_s20 = sphi %s1375_s20, %s1676_s20   ;;  %s1313_s19 = sphi %s1373_s19, %s1675_s19   ;;  %s1309_s18 = sphi %s1371_s18, %s1674_s18  }
   0x7   : > { %s33_s26 = sadd.s32 1, %s1325_s22  ;;  %s92_s27 = sadd.s32 1, %s1317_s20 }
   0x8   : > { %p35_p0 = scmp.ge.s32.totalorder %s33_s26, 3  ;;  %p99_p1 = scmp.ne.s32.totalorder %s1317_s20, %s1313_s19 }
   0x9   : > { %p100_p2 = scmp.eq.s32.totalorder %s1329_s23, 0  ;;  %p105_p3 = scmp.ne.s32.totalorder %s1313_s19, %s1309_s18 }
   0xa   : > { %s1680_s26 = smov (%p35_p0, %s33_s26), 0  ;;  %p106_p5 = scmp.eq.s32.totalorder %s1040_s24, 0 }
   0xb   : > { %p1412_p4 = por %p100_p2, %p99_p1  ;;  %s89_s29 = ssub.s32 %s1325_s22, %s1680_s26 }
   0xc   : > { %p183_p6 = scmp.eq.s32.totalorder %s1040_s24, 2  ;;  %p90_p7 = scmp.eq.s32.totalorder %s89_s29, 0 }
   0xd   : > { %p1418_p8 = por %p106_p5, %p105_p3  ;;  %p189_p10 = scmp.eq.s32.totalorder %s1041_s25, 2 }
   0xe   : > { %p1422_p9 = por %p183_p6, %p99_p1  ;;  %p1107_p12 = scmp.lt.s32.totalorder %s1329_s23, 3 }
   0xf   : > { %s1427_s7 = scalar_select %p90_p7, %s1317_s20, %s92_s27  }
  0x10   : > { %s1667_s6 = scalar_select %p1422_p9, 1, 0 }
  0x11   : > { %p1429_p11 = por %p189_p10, %p105_p3  ;;  %s229_s9 = sand.u32 1, %s1317_s20  }
  0x12   : > { %s1046_s10 = sshll.u32 %s229_s9, 8  ;;  %s1093_s11 = sshll.u32 %s1325_s22, 8 }
  0x13   : > { %s1668_s8 = scalar_select %p1429_p11, 1, 0 }
  0x14   : > { %s1439_s14 = scalar_lea.hbm %s1660_s2, %s1093_s11  ;;  %s233_s15 = scalar_lea.vmem [#allocation2], %s1046_s10 }
  0x15   : > { %s240_s16 = sshll.u32 %s233_s15, 4  ;;  %p1445_p13 = pnand %p1107_p12, %p1412_p4  ;;  %s1441_s16 = int_to_ptr.vmem [resolvable:$true] %s240_s16 }
  0x16   : > { %s1449_s24 = scalar_lea.sflag [#allocation3], %s229_s9  ;;  %s1217_s25 = scalar_lea.hbm %s1439_s14, 4096 }
  0x17   : > { %p1218_p0 = scmp.ne.s32.totalorder %s1439_s14, %s1217_s25  ;;  %p1219_p1 = pneg %p1445_p13 }
  0x18   : > { %s1222_s28 = scalar_lea.hbm %s1660_s2, 12288  ;;  %p1223_p4 = scmp.lt.u32.totalorder %s1439_s14, %s1660_s2 }
  0x19   : > { %p1220_p2 = pnand %p1219_p1, %p1218_p0  ;;  %p1224_p5 = scmp.lt.u32.totalorder %s1222_s28, %s1217_s25 }
  0x1a   : > { %p1226_p7 = scmp.lt.u32.totalorder %s1217_s25, %s1439_s14 }
  0x1b   : > { %p1221_p3 = pneg %p1220_p2  ;;  %p1225_p6 = por %p1224_p5, %p1223_p4 }
  0x1d   : > { %p1227_p10 = por %p1226_p7, %p1225_p6 }
  0x1f   : > { %p1228_p12 = pnand %p1227_p10, %p1221_p3 }
  0x21   : > { %1231 = shalt.err (!%p1228_p12)
}
  0x22   : > { %s1232_s9 = scalar_lea.vmem %s1441_s16, 4096  ;;  %s1331_s12 = smov [#allocation2]  }
  0x23   : > { %p1233_p0 = scmp.ne.s32.totalorder %s1441_s16, %s1232_s9  ;;  %s1237_s13 = sshll.u32 %s1331_s12, 4  ;;  %s1238_s13 = int_to_ptr.vmem [resolvable:$false] %s1237_s13 }
  0x24   : > { %s1239_s15 = scalar_lea.vmem %s1238_s13, 8192  ;;  %p1240_p9 = scmp.lt.s32.totalorder %s1441_s16, %s1238_s13 }
  0x25   : > { %p1235_p2 = pnand %p1233_p0, %p1219_p1  ;;  %p1241_p4 = scmp.lt.s32.totalorder %s1239_s15, %s1232_s9 }
  0x27   : > { %p1236_p11 = pneg %p1235_p2  ;;  %p1242_p5 = por %p1241_p4, %p1240_p9 }
  0x29   : > { %p1243_p6 = pnand %p1242_p5, %p1236_p11 }
  0x2b   : > { %1246 = shalt.err (!%p1243_p6)
}
  0x2c   : > { %s1332_s25 = smov 768   ;;  %s1333_s27 = smov 256  }
  0x2d   : > { %s1334_s29 = smov 16   ;;  %p1049_p1 = scmp.ge.s32.totalorder %s1329_s23, 1 }
  0x2e   : > { %1102 = dma.hbm_to_vmem [thread:$0]  (!%p1445_p13), %s1439_s14, 4096, %s1441_s16, %s1449_s24, %s1332_s25, %s1333_s27, %s1334_s29  }
  0x2f   : > { %p264_p3 = scmp.lt.s32.totalorder %s1329_s23, 4 }
  0x31   : > { %p265_p7 = pnand %p1049_p1, %p264_p3 }
  0x32   : > { %s1480_s28 = sand.u32 (!%p265_p7), 1, %s1313_s19  }
  0x33   : > { %268 = sbr.rel (%p265_p7) target bundleno = 363 (0x16b), region = 40  ;;  %s1050_s10 = sshll.u32 (!%p265_p7), %s1480_s28, 8 }
  0x34   : > { %s271_s11 = scalar_lea.sflag (!%p265_p7), [#allocation3], %s1480_s28  ;;  %s1484_s9 = scalar_lea.vmem (!%p265_p7), [#allocation2], %s1050_s10 }
  0x3a   : > { %1300 = dma.done.wait (%p1418_p8), %s271_s11, 4096  }
  0x3b   : > { %1302 = vsyncadd (%p1418_p8), %s271_s11, 4294963200  ;;  %v1335_v0 = vmov 0   ;;  %v1167_v1 = vld [vmem:[%s1484_s9 + $0x4] ss:$16 sps:$4 sm:$0xff]   ;;  %v1169_v2 = vld [vmem:[%s1484_s9 + $0xc] ss:$16 sps:$4 sm:$0xff]   ;;  %v761_v39 = vlaneseq }
  0x3c   : > { %589 = vmatprep.mubr.bf16.mxu0 %v1335_v0  ;;  %642 = vmatprep.mubr.bf16.mxu1 %v1335_v0  ;;  %v1171_v3 = vld [vmem:[%s1484_s9] ss:$16 sps:$4 sm:$0xff]   ;;  %v1172_v4 = vld [vmem:[%s1484_s9 + $0x8] ss:$16 sps:$4 sm:$0xff]   ;;  %v1173_v5 = vld [vmem:[%s1484_s9 + $0x24] ss:$16 sps:$4 sm:$0xff]  }
  0x3d   : > { %1165 = vset.pattern.permute.xlu0 %v1335_v0  ;;  %1166 = vset.pattern.permute.xlu1 %v1335_v0  ;;  %v1175_v6 = vld [vmem:[%s1484_s9 + $0x2c] ss:$16 sps:$4 sm:$0xff]   ;;  %v1177_v7 = vld [vmem:[%s1484_s9 + $0x20] ss:$16 sps:$4 sm:$0xff]   ;;  %v1178_v8 = vld [vmem:[%s1484_s9 + $0x28] ss:$16 sps:$4 sm:$0xff]  }
  0x3e   : > { %557 = vmatprep.subr.bf16.mxu0 %v1167_v1  ;;  %610 = vmatprep.subr.bf16.mxu1 %v1169_v2  ;;  %v1179_v9 = vld [vmem:[%s1484_s9 + $0x44] ss:$16 sps:$4 sm:$0xff]   ;;  %v1181_v10 = vld [vmem:[%s1484_s9 + $0x4c] ss:$16 sps:$4 sm:$0xff]   ;;  %v1183_v11 = vld [vmem:[%s1484_s9 + $0x40] ss:$16 sps:$4 sm:$0xff]  }
  0x3f   : > { %558 = vmatpush1.bf16.msra.mxu0 %v1171_v3  ;;  %611 = vmatpush1.bf16.msra.mxu1 %v1172_v4  ;;  %v1184_v12 = vld [vmem:[%s1484_s9 + $0x48] ss:$16 sps:$4 sm:$0xff]   ;;  %v1185_v13 = vld [vmem:[%s1484_s9 + $0x64] ss:$16 sps:$4 sm:$0xff]   ;;  %v1187_v14 = vld [vmem:[%s1484_s9 + $0x6c] ss:$16 sps:$4 sm:$0xff]  }
  0x40   : > { %559 = vmatprep.subr.bf16.mxu0 %v1173_v5  ;;  %612 = vmatprep.subr.bf16.mxu1 %v1175_v6  ;;  %v1189_v15 = vld [vmem:[%s1484_s9 + $0x60] ss:$16 sps:$4 sm:$0xff]   ;;  %v1190_v16 = vld [vmem:[%s1484_s9 + $0x68] ss:$16 sps:$4 sm:$0xff]   ;;  %v1191_v17 = vld [vmem:[%s1484_s9 + $0x84] ss:$16 sps:$4 sm:$0xff]  }
  0x41   : > { %v1193_v18 = vld [vmem:[%s1484_s9 + $0x8c] ss:$16 sps:$4 sm:$0xff]   ;;  %v1195_v19 = vld [vmem:[%s1484_s9 + $0x80] ss:$16 sps:$4 sm:$0xff]   ;;  %v1196_v20 = vld [vmem:[%s1484_s9 + $0x88] ss:$16 sps:$4 sm:$0xff]  }
  0x42   : > { %v1197_v21 = vld [vmem:[%s1484_s9 + $0xa4] ss:$16 sps:$4 sm:$0xff]   ;;  %v1199_v22 = vld [vmem:[%s1484_s9 + $0xac] ss:$16 sps:$4 sm:$0xff]   ;;  %v1201_v23 = vld [vmem:[%s1484_s9 + $0xa0] ss:$16 sps:$4 sm:$0xff]  }
  0x43   : > { %560 = vmatpush1.bf16.msra.mxu0 %v1177_v7  ;;  %613 = vmatpush1.bf16.msra.mxu1 %v1178_v8  ;;  %v1202_v24 = vld [vmem:[%s1484_s9 + $0xa8] ss:$16 sps:$4 sm:$0xff]   ;;  %v1203_v25 = vld [vmem:[%s1484_s9 + $0xc4] ss:$16 sps:$4 sm:$0xff]   ;;  %v1205_v26 = vld [vmem:[%s1484_s9 + $0xcc] ss:$16 sps:$4 sm:$0xff]  }
  0x44   : > { %561 = vmatprep.subr.bf16.mxu0 %v1179_v9  ;;  %614 = vmatprep.subr.bf16.mxu1 %v1181_v10  ;;  %v663_v27 = vld [vmem:[%s1659_s1] sm:$0xff]  ;;  %v1208_v29 = vld [vmem:[%s1484_s9 + $0xc8] ss:$16 sps:$4 sm:$0xff]   ;;  %v665_v30 = vld [vmem:[%s1659_s1 + $0x10] sm:$0xff]  ;;  %s1052_s11 = sshll.u32 %s1321_s21, 2  ;;  %v762_v41 = vshrl.u32 %v761_v39, 7 }
  0x45   : > { %v1207_v28 = vld [vmem:[%s1484_s9 + $0xc0] ss:$16 sps:$4 sm:$0xff]   ;;  %v1209_v31 = vld [vmem:[%s1484_s9 + $0xe4] ss:$16 sps:$4 sm:$0xff]   ;;  %v1211_v32 = vld [vmem:[%s1484_s9 + $0xec] ss:$16 sps:$4 sm:$0xff]   ;;  %669 = vperm.xlu0 %1165, %v663_v27   ;;  %679 = vperm.xlu1 %1166, %v665_v30  }
  0x46   : > { %v664_v33 = vld [vmem:[%s1659_s1 + $0x8] sm:$0xff]  ;;  %v666_v34 = vld [vmem:[%s1659_s1 + $0x18] sm:$0xff]  ;;  %v1213_v35 = vld [vmem:[%s1484_s9 + $0xe0] ss:$16 sps:$4 sm:$0xff]   ;;  %p337_p8 = scmp.lt.s32.totalorder %s1052_s11, 11  ;;  %v763_v42 = vsub.s32 0, %v762_v41 }
  0x47   : > { %562 = vmatpush1.bf16.msra.mxu0 %v1183_v11  ;;  %615 = vmatpush1.bf16.msra.mxu1 %v1184_v12  ;;  %v1214_v36 = vld [vmem:[%s1484_s9 + $0xe8] ss:$16 sps:$4 sm:$0xff]   ;;  %v1215_v37 = vld [vmem:[%s1658_s0] sm:$0xff]   ;;  %v1336_v43 = vmov 1966171168   ;;  %v771_v52 = vsub.s32 2, %v762_v41 }
  0x48   : > { %563 = vmatprep.subr.bf16.mxu0 %v1185_v13  ;;  %616 = vmatprep.subr.bf16.mxu1 %v1187_v14  ;;  %v1216_v38 = vld [vmem:[%s1658_s0 + $0x8] sm:$0xff]   ;;  %s1682_s11 = smov (!%p337_p8, %s1052_s11), 11  ;;  %v838_v44 = vunpack.c.l.s4 %v1336_v43  ;;  %v767_v53 = vsub.s32 1, %v762_v41  ;;  %v775_v58 = vsub.s32 3, %v762_v41  ;;  %s1051_s12 = sshll.u32 %s1480_s28, 3  ;;  %vm1590_vm0 = vcmp.lt.s32.totalorder %v761_v39, 512 }
  0x49   : > { %674 = vperm.xlu0 %1165, %v664_v33   ;;  %684 = vperm.xlu1 %1166, %v666_v34   ;;  %s339_s14 = scalar_lea.vmem %s1661_s3, %s1682_s11  ;;  %s344_s24 = scalar_lea.vmem %s1662_s4, %s1682_s11 }
  0x4a   : > { %v759_v46 = vld [vmem:[%s339_s14] sm:$0xf]  ;;  %v839_v57 = vunpack.c.0.s8 %v838_v44  ;;  %s320_s13 = scalar_lea.vmem [#allocation5], %s1051_s12  ;;  %s1094_s15 = sshll.u32 %s1321_s21, 6 }
  0x4b   : > { %564 = vmatpush1.bf16.msra.mxu0 %v1189_v15  ;;  %617 = vmatpush1.bf16.msra.mxu1 %v1190_v16  ;;  %v1554_v55 = vrot.slane %v759_v46, %v763_v42  ;;  %v797_v62 = vld [vmem:[%s344_s24] sm:$0xf]  ;;  %v1556_v8 = vrot.slane %v759_v46, %v771_v52  ;;  %v1558_v9 = vrot.slane %v759_v46, %v767_v53  ;;  %s908_s25 = sshll.u32 %s320_s13, 4  ;;  %s1605_s10 = scalar_lea.hbm %s1663_s5, %s1094_s15  ;;  %s1607_s25 = int_to_ptr.vmem [resolvable:$true] %s908_s25 }
  0x4c   : > { %565 = vmatprep.subr.bf16.mxu0 %v1191_v17  ;;  %618 = vmatprep.subr.bf16.mxu1 %v1193_v18  ;;  %v1560_v10 = vrot.slane %v797_v62, %v763_v42  ;;  %v1562_v13 = vrot.slane %v759_v46, %v775_v58  ;;  %v1564_v16 = vrot.slane %v797_v62, %v771_v52  ;;  %s892_s21 = scalar_lea.sflag [#allocation4], %s1480_s28  ;;  %s1247_s11 = scalar_lea.vmem %s1607_s25, 128 }
  0x4d   : > { %v1566_v17 = vrot.slane %v797_v62, %v767_v53  ;;  %p1248_p9 = scmp.ne.s32.totalorder %s1607_s25, %s1247_s11  ;;  %p1672_p11 = scmp.ne.s32.totalorder %s1667_s6, 0 }
  0x4e   : > { %s1337_s9 = smov [#allocation5]  }
  0x4f   : > { %566 = vmatpush1.bf16.msra.mxu0 %v1195_v19  ;;  %619 = vmatpush1.bf16.msra.mxu1 %v1196_v20  ;;  %v1568_v20 = vsub.s32 %v839_v57, %v762_v41  ;;  %p1249_p13 = pnand %p1248_p9, %p1672_p11  ;;  %s1251_s30 = sshll.u32 %s1337_s9, 4  ;;  %s1252_s30 = int_to_ptr.vmem [resolvable:$false] %s1251_s30 }
  0x50   : > { %567 = vmatprep.subr.bf16.mxu0 %v1197_v21  ;;  %620 = vmatprep.subr.bf16.mxu1 %v1199_v22  ;;  %v1570_v22 = vrot.slane %v797_v62, %v775_v58  ;;  %s1253_s14 = scalar_lea.vmem %s1252_s30, 256  ;;  %p1254_p12 = scmp.lt.s32.totalorder %s1607_s25, %s1252_s30 }
  0x51   : > { %p1250_p10 = pneg %p1249_p13  ;;  %p1255_p0 = scmp.lt.s32.totalorder %s1253_s14, %s1247_s11 }
  0x53   : > { %568 = vmatpush1.bf16.msra.mxu0 %v1201_v23  ;;  %621 = vmatpush1.bf16.msra.mxu1 %v1202_v24  ;;  %p1256_p2 = por %p1255_p0, %p1254_p12 }
  0x54   : > { %569 = vmatprep.subr.bf16.mxu0 %v1203_v25  ;;  %622 = vmatprep.subr.bf16.mxu1 %v1205_v26 }
  0x55   : > { %p1257_p4 = pnand %p1256_p2, %p1250_p10 }
  0x57   : > { %570 = vmatpush1.bf16.msra.mxu0 %v1207_v28  ;;  %623 = vmatpush1.bf16.msra.mxu1 %v1208_v29 }
  0x58   : > { %571 = vmatprep.subr.bf16.mxu0 %v1209_v31  ;;  %624 = vmatprep.subr.bf16.mxu1 %v1211_v32 }
  0x5b   : > { %572 = vmatpush1.bf16.msra.mxu0 %v1213_v35  ;;  %625 = vmatpush1.bf16.msra.mxu1 %v1214_v36 }
  0x5e   : > { %590 = vmatmul.mubr.bf16.vlgmr.msra.gmra.mrb[0].mxu0 %v1215_v37  ;;  %643 = vmatmul.mubr.bf16.vlgmr.msra.gmra.mrb[0].mxu1 %v1215_v37 }
  0x5f   : > { %599 = vmatprep.mubr.bf16.mxu0 %v1335_v0  ;;  %652 = vmatprep.mubr.bf16.mxu1 %v1335_v0 }
  0x66   : > { %600 = vmatmul.mubr.bf16.gmra.mrb[4].mxu0 %v1216_v38  ;;  %653 = vmatmul.mubr.bf16.gmra.mrb[4].mxu1 %v1216_v38 }
  0xc4   : > { %v670_v40 = vpop.permute.xlu0 %669  ;;  %v680_v47 = vpop.permute.xlu1 %679 }
  0xc8   : > { %v675_v45 = vpop.permute.xlu0 %674  ;;  %v685_v18 = vpop.permute.xlu1 %684 }
 0x131   : > { %v591_v48 = vpop.f32.mrb[0].mxu0  ;;  %v644_v49 = vpop.f32.mrb[0].mxu1 }
 0x132   : > { %v593_v50 = vpop.f32.mrb[1].mxu0  ;;  %v646_v51 = vpop.f32.mrb[1].mxu1  ;;  %v687_v59 = vadd.f32 %v670_v40, %v591_v48  ;;  %v689_v60 = vadd.f32 %v670_v40, %v644_v49 }
 0x133   : > { %v595_v54 = vpop.f32.mrb[2].mxu0  ;;  %v648_v56 = vpop.f32.mrb[2].mxu1  ;;  %v688_v2 = vadd.f32 %v670_v40, %v593_v50  ;;  %v690_v3 = vadd.f32 %v670_v40, %v646_v51 }
 0x134   : > { %v691_v61 = vadd.f32 %v675_v45, %v595_v54  ;;  %v693_v63 = vadd.f32 %v675_v45, %v648_v56  ;;  %v597_v0 = vpop.f32.mrb[3].mxu0  ;;  %v650_v1 = vpop.f32.mrb[3].mxu1 }
 0x135   : > { %v692_v4 = vadd.f32 %v675_v45, %v597_v0  ;;  %v694_v5 = vadd.f32 %v675_v45, %v650_v1 }
 0x136   : > { %v703_v6 = vmax.f32 %v687_v59, %v691_v61  ;;  %v717_v7 = vmax.f32 %v689_v60, %v693_v63 }
 0x137   : > { %v710_v11 = vmax.f32 %v688_v2, %v692_v4  ;;  %v724_v12 = vmax.f32 %v690_v3, %v694_v5 }
 0x138   : > { %v704_v14 = vrot.slane %v703_v6, 4  ;;  %v718_v15 = vrot.slane %v717_v7, 4 }
 0x139   : > { %v711_v19 = vrot.slane %v710_v11, 4  ;;  %v725_v21 = vrot.slane %v724_v12, 4  ;;  %v601_v23 = vpop.f32.mrb[4].mxu0  ;;  %v654_v24 = vpop.f32.mrb[4].mxu1 }
 0x13a   : > { %v705_v25 = vmax.f32 %v703_v6, %v704_v14  ;;  %v719_v26 = vmax.f32 %v717_v7, %v718_v15  ;;  %v695_v27 = vadd.f32 %v680_v47, %v601_v23  ;;  %v697_v28 = vadd.f32 %v680_v47, %v654_v24  ;;  %v603_v29 = vpop.f32.mrb[5].mxu0  ;;  %v656_v30 = vpop.f32.mrb[5].mxu1 }
 0x13b   : > { %v712_v31 = vmax.f32 %v710_v11, %v711_v19  ;;  %v726_v32 = vmax.f32 %v724_v12, %v725_v21  ;;  %v696_v33 = vadd.f32 %v680_v47, %v603_v29  ;;  %v698_v34 = vadd.f32 %v680_v47, %v656_v30  ;;  %v605_v35 = vpop.f32.mrb[6].mxu0  ;;  %v658_v36 = vpop.f32.mrb[6].mxu1 }
 0x13c   : > { %v706_v37 = vrot.slane %v705_v25, 2  ;;  %v720_v38 = vrot.slane %v719_v26, 2  ;;  %v699_v40 = vadd.f32 %v685_v18, %v605_v35  ;;  %v701_v41 = vadd.f32 %v685_v18, %v658_v36  ;;  %v607_v42 = vpop.f32.mrb[7].mxu0  ;;  %v660_v43 = vpop.f32.mrb[7].mxu1 }
 0x13d   : > { %v713_v44 = vrot.slane %v712_v31, 2  ;;  %v727_v45 = vrot.slane %v726_v32, 2  ;;  %v700_v46 = vadd.f32 %v685_v18, %v607_v42  ;;  %v702_v48 = vadd.f32 %v685_v18, %v660_v43 }
 0x13e   : > { %v707_v49 = vmax.f32 %v705_v25, %v706_v37  ;;  %v721_v50 = vmax.f32 %v719_v26, %v720_v38  ;;  %v731_v51 = vmax.f32 %v695_v27, %v699_v40  ;;  %v745_v52 = vmax.f32 %v697_v28, %v701_v41 }
 0x13f   : > { %v714_v53 = vmax.f32 %v712_v31, %v713_v44  ;;  %v728_v54 = vmax.f32 %v726_v32, %v727_v45  ;;  %v738_v56 = vmax.f32 %v696_v33, %v700_v46  ;;  %v752_v47 = vmax.f32 %v698_v34, %v702_v48 }
 0x140   : > { %v708_v57 = vrot.slane %v707_v49, 1  ;;  %v722_v58 = vrot.slane %v721_v50, 1  ;;  %v732_v59 = vrot.slane %v731_v51, 4  ;;  %v746_v60 = vrot.slane %v745_v52, 4 }
 0x141   : > { %v715_v61 = vrot.slane %v714_v53, 1  ;;  %v729_v62 = vrot.slane %v728_v54, 1  ;;  %v739_v63 = vrot.slane %v738_v56, 4  ;;  %v753_v0 = vrot.slane %v752_v47, 4 }
 0x142   : > { %v709_v1 = vmax.f32 %v707_v49, %v708_v57  ;;  %v723_v2 = vmax.f32 %v721_v50, %v722_v58  ;;  %v733_v3 = vmax.f32 %v731_v51, %v732_v59  ;;  %v747_v4 = vmax.f32 %v745_v52, %v746_v60 }
 0x143   : > { %v716_v5 = vmax.f32 %v714_v53, %v715_v61  ;;  %v730_v6 = vmax.f32 %v728_v54, %v729_v62  ;;  %v740_v7 = vmax.f32 %v738_v56, %v739_v63  ;;  %v754_v11 = vmax.f32 %v752_v47, %v753_v0 }
 0x144   : > { %v781_v12 = vadd.f32 %v1554_v55, %v709_v1  ;;  %v783_v14 = vadd.f32 %v1556_v8, %v723_v2  ;;  %v734_v15 = vrot.slane %v733_v3, 2  ;;  %v748_v18 = vrot.slane %v747_v4, 2 }
 0x145   : > { %v782_v19 = vadd.f32 %v1558_v9, %v716_v5  ;;  %v784_v21 = vadd.f32 %v1562_v13, %v730_v6  ;;  %v741_v23 = vrot.slane %v740_v7, 2  ;;  %v755_v24 = vrot.slane %v754_v11, 2 }
 0x146   : > { %v789_v25 = vmax.f32 %v781_v12, 0.0  ;;  %v791_v26 = vmax.f32 %v783_v14, 0.0  ;;  %v735_v27 = vmax.f32 %v733_v3, %v734_v15  ;;  %v749_v28 = vmax.f32 %v747_v4, %v748_v18 }
 0x147   : > { %v790_v29 = vmax.f32 %v782_v19, 0.0  ;;  %v792_v30 = vmax.f32 %v784_v21, 0.0  ;;  %v742_v31 = vmax.f32 %v740_v7, %v741_v23  ;;  %v756_v32 = vmax.f32 %v754_v11, %v755_v24 }
 0x148   : > { %v819_v33 = vmul.f32 %v1560_v10, %v789_v25  ;;  %v821_v34 = vmul.f32 %v1564_v16, %v791_v26  ;;  %v736_v35 = vrot.slane %v735_v27, 1  ;;  %v750_v36 = vrot.slane %v749_v28, 1 }
 0x149   : > { %v820_v37 = vmul.f32 %v1566_v17, %v790_v29  ;;  %v822_v38 = vmul.f32 %v1570_v22, %v792_v30  ;;  %v743_v40 = vrot.slane %v742_v31, 1  ;;  %v757_v41 = vrot.slane %v756_v32, 1 }
 0x14a   : > { %v737_v42 = vmax.f32 %v735_v27, %v736_v35  ;;  %v751_v43 = vmax.f32 %v749_v28, %v750_v36 }
 0x14b   : > { %v835_v44 = vcombine.low %v819_v33, %v820_v37  ;;  %v836_v45 = vcombine.low %v821_v34, %v822_v38  ;;  %v744_v46 = vmax.f32 %v742_v31, %v743_v40  ;;  %v758_v48 = vmax.f32 %v756_v32, %v757_v41 }
 0x14c   : > { %v785_v49 = vadd.f32 %v1554_v55, %v737_v42  ;;  %v787_v50 = vadd.f32 %v1556_v8, %v751_v43 }
 0x14d   : > { %v843_v51 = vrot.slane %v835_v44, %v1568_v20  ;;  %v850_v52 = vrot.slane %v836_v45, %v1568_v20  ;;  %v786_v53 = vadd.f32 %v1558_v9, %v744_v46  ;;  %v788_v54 = vadd.f32 %v1562_v13, %v758_v48 }
 0x14e   : > { %v793_v56 = vmax.f32 %v785_v49, 0.0  ;;  %v795_v47 = vmax.f32 %v787_v50, 0.0 }
 0x14f   : > { %v851_v57 = vcombine.low %v843_v51, %v850_v52  ;;  %v794_v58 = vmax.f32 %v786_v53, 0.0  ;;  %v796_v59 = vmax.f32 %v788_v54, 0.0 }
 0x150   : > { %v823_v60 = vmul.f32 %v1560_v10, %v793_v56  ;;  %v825_v55 = vmul.f32 %v1564_v16, %v795_v47 }
 0x151   : > { %v858_v9 = vrot.slane %v851_v57, %v1568_v20  ;;  %v824_v13 = vmul.f32 %v1566_v17, %v794_v58  ;;  %v826_v61 = vmul.f32 %v1570_v22, %v796_v59 }
 0x153   : > { %v859_v62 = vcombine.low %v823_v60, %v824_v13  ;;  %v860_v63 = vcombine.low %v825_v55, %v826_v61  ;;  %889 = vst.msk [vmem:[%s320_s13] sm:$0xf] %vm1590_vm0, %v858_v9 }
 0x155   : > { %v867_v39 = vrot.slane %v859_v62, %v1568_v20  ;;  %v874_v10 = vrot.slane %v860_v63, %v1568_v20 }
 0x157   : > { %v875_v16 = vcombine.low %v867_v39, %v874_v10 }
 0x159   : > { %v882_v17 = vrot.slane %v875_v16, %v1568_v20 }
 0x15b   : > { %890 = vst.msk [vmem:[%s320_s13 + $0x4] sm:$0xf] %vm1590_vm0, %v882_v17 }
 0x15c   : > { %1260 = shalt.err (!%p1257_p4)
}
 0x15d   : > { %s1261_s16 = scalar_lea.hbm %s1605_s10, 128  ;;  %s1265_s12 = scalar_lea.hbm %s1663_s5, 384 }
 0x15e   : > { %p1262_p5 = scmp.ne.s32.totalorder %s1605_s10, %s1261_s16  ;;  %p1266_p3 = scmp.lt.u32.totalorder %s1605_s10, %s1663_s5 }
 0x15f   : > { %p1267_p7 = scmp.lt.u32.totalorder %s1265_s12, %s1261_s16  ;;  %p1269_p9 = scmp.lt.u32.totalorder %s1261_s16, %s1605_s10 }
 0x160   : > { %p1263_p6 = pnand %p1262_p5, %p1672_p11 }
 0x161   : > { %p1268_p8 = por %p1267_p7, %p1266_p3 }
 0x162   : > { %p1264_p1 = pneg %p1263_p6 }
 0x163   : > { %p1270_p13 = por %p1269_p9, %p1268_p8 }
 0x165   : > { %p1271_p10 = pnand %p1270_p13, %p1264_p1 }
 0x167   : > { %1274 = shalt.err (!%p1271_p10)
}
 0x168   : > { %s1338_s27 = smov 64   ;;  %s1339_s29 = smov 192  }
 0x169   : > { %s1340_s11 = smov 4  }
 0x16a   : > { %1097 = dma.vmem_to_hbm [thread:$0]  (%p1672_p11), %s1607_s25, 128, %s1605_s10, %s892_s21, %s1338_s27, %s1339_s29, %s1340_s11  }
 0x16b PF: > { %p1108_p12 = scmp.ge.s32.totalorder %s1329_s23, 2  ;;  %s923_s9 = sand.u32 1, %s1309_s18  }
 0x16c   : > { %p1673_p0 = scmp.ne.s32.totalorder %s1668_s8, 0  ;;  %s924_s30 = scalar_lea.sflag [#allocation4], %s923_s9 }
 0x16e   : > { %p1104_p2 = pnand %p1108_p12, %p1673_p0 }
 0x170   : > { %1304 = dma.done.wait (!%p1104_p2), %s924_s30, 128  }
 0x171   : > { %1306 = vsyncadd (!%p1104_p2), %s924_s30, 4294967168  ;;  %s21_s23 = sadd.s32 1, %s1329_s23   ;;  %s1674_s18 = smov %s1313_s19 }
 0x172   : > { %p18_p4 = scmp.ge.s32.totalorder %s21_s23, 5   ;;  %s1675_s19 = smov %s1317_s20 }
 0x173   : > { %s1676_s20 = smov %s1427_s7  ;;  %s1677_s21 = smov %s1325_s22 }
 0x174   : > { %s1678_s22 = smov %s1680_s26  ;;  %20 = sbr.rel (!%p18_p4) target bundleno = 6 (0x6), region = 97 }
 0x17b   :  { %929 = vsyncpa [#allocation3], 1 }
 0x17c   :  { %931 = vsyncpa [#allocation3 + $0x1], 1 }
 0x17d   :  { %932 = vsyncpa [#allocation4], 1 }
 0x17e   :  { %934 = vsyncpa [#allocation4 + $0x1], 1 }

</bundles_post_ra>
